<compile_context>
chip_gen: v7x
topology: tpu7x:2x2x1
jax: 0.10.0
libtpu: 0.0.40
codegen_flags: <defaults>
</compile_context>

<pallas_src>
import functools

import jax
import jax.numpy as jnp
from jax.experimental import pallas as pl
from jax.experimental.pallas import tpu as pltpu


def _bn_affine_kernel(x_ref, scale_ref, shift_ref, o_ref):
    # x_ref: (tile_r, tile_l); scale/shift: (tile_r, 1) broadcast across the
    # 128-lane (spatial) axis.  Single fused multiply-add on the VPU.
    o_ref[...] = x_ref[...] * scale_ref[...] + shift_ref[...]


def _round_up(v, m):
    return (v + m - 1) // m * m


@functools.partial(jax.jit, static_argnums=(5, 6, 7))
def _bn_inference_impl(x_nchw, running_mean, running_var, weight, bias,
                       eps, block_rows, block_cols):
    n, c, h, w = x_nchw.shape
    rows = n * c
    cols = h * w

    # Free reshape: NCHW -> (N*C, H*W); spatial axis lands on the lane dim.
    x2d = x_nchw.reshape(rows, cols)

    # Fold normalization into a per-channel affine (tiny (C,) ops, done in f32).
    scale_c = weight.astype(jnp.float32) * jax.lax.rsqrt(
        running_var.astype(jnp.float32) + eps)
    shift_c = bias.astype(jnp.float32) - running_mean.astype(jnp.float32) * scale_c
    # Per-row params: row r of the slab corresponds to channel r % C.
    scale_r = jnp.tile(scale_c, n).reshape(rows, 1).astype(x2d.dtype)
    shift_r = jnp.tile(shift_c, n).reshape(rows, 1).astype(x2d.dtype)

    # Pad only up to (8, 128) vreg alignment (at most 7 rows / 127 lanes).
    # Edge tiles beyond that are handled by Pallas partial blocks, so we never
    # materialize a padded copy that meaningfully inflates HBM traffic.
    rows_a = _round_up(rows, 8)
    cols_a = _round_up(cols, 128)
    if rows_a != rows or cols_a != cols:
        x2d = jnp.pad(x2d, ((0, rows_a - rows), (0, cols_a - cols)))
        scale_r = jnp.pad(scale_r, ((0, rows_a - rows), (0, 0)))
        shift_r = jnp.pad(shift_r, ((0, rows_a - rows), (0, 0)))

    # Tile selection: (8, 128)-aligned, capped by the array extents.
    tr = min(block_rows, rows_a)
    tl = min(block_cols, cols_a)
    grid = (pl.cdiv(rows_a, tr), pl.cdiv(cols_a, tl))

    out2d = pl.pallas_call(
        _bn_affine_kernel,
        out_shape=jax.ShapeDtypeStruct((rows_a, cols_a), x2d.dtype),
        grid_spec=pltpu.PrefetchScalarGridSpec(
            num_scalar_prefetch=0,
            grid=grid,
            in_specs=[
                pl.BlockSpec((tr, tl), lambda i, j: (i, j)),
                pl.BlockSpec((tr, 1), lambda i, j: (i, 0)),
                pl.BlockSpec((tr, 1), lambda i, j: (i, 0)),
            ],
            out_specs=pl.BlockSpec((tr, tl), lambda i, j: (i, j)),
        ),
        compiler_params=pltpu.CompilerParams(
            dimension_semantics=("parallel", "parallel")),
    )(x2d, scale_r, shift_r)

    # Drop alignment padding (if any) and restore NCHW — free reshape, no
    # transpose anywhere in the pipeline.
    return out2d[:rows, :cols].reshape(n, c, h, w)


def batch_norm_inference(x_nchw, running_mean, running_var, weight=None,
                         bias=None, eps=1e-5, block_rows=256, block_cols=2048):
    """Eval-mode batch norm (matches F.batch_norm with training=False).

    x_nchw: (N, C, H, W); running_mean/var/weight/bias: (C,).
    weight/bias may be None (affine=False) -> identity affine.
    """
    _, c, _, _ = x_nchw.shape
    if weight is None:
        weight = jnp.ones((c,), dtype=jnp.float32)
    if bias is None:
        bias = jnp.zeros((c,), dtype=jnp.float32)
    return _bn_inference_impl(x_nchw, running_mean, running_var, weight, bias,
                              float(eps), int(block_rows), int(block_cols))


if __name__ == "__main__":
    key = jax.random.PRNGKey(0)
    k_x, k_m, k_v, k_w, k_b = jax.random.split(key, 5)

    N, C, H, W = 2, 4, 16, 16
    eps = 1e-5

    x = jax.random.normal(k_x, (N, C, H, W), dtype=jnp.float32)

    # Parameter shapes from _NormBase.__init__: all (num_features,) = (C,).
    running_mean = jax.random.normal(k_m, (C,), dtype=jnp.float32) * 0.5
    running_var = jax.random.uniform(k_v, (C,), dtype=jnp.float32,
                                     minval=0.5, maxval=2.0)
    weight = jax.random.normal(k_w, (C,), dtype=jnp.float32) * 0.1 + 1.0
    bias = jax.random.normal(k_b, (C,), dtype=jnp.float32) * 0.1

    y = batch_norm_inference(x, running_mean, running_var, weight, bias, eps)
    y = jax.block_until_ready(y)

    # Pure-JAX reference (same semantics as F.batch_norm in eval mode, NCHW).
    rm = running_mean.reshape(1, C, 1, 1)
    rv = running_var.reshape(1, C, 1, 1)
    ww = weight.reshape(1, C, 1, 1)
    bb = bias.reshape(1, C, 1, 1)
    y_ref = (x - rm) / jnp.sqrt(rv + eps) * ww + bb

    assert y.shape == (N, C, H, W)
    assert jnp.allclose(y, y_ref, atol=1e-5, rtol=1e-5), "mismatch vs reference"
    print("KERNEL_OK")
</pallas_src>

<mosaic_0001>
module attributes {stable_mosaic.version = 11 : i64} {
  func.func @_bn_affine_kernel(%arg0: i32, %arg1: i32, %arg2: memref<8x256xf32, #tpu.memory_space<vmem>>, %arg3: memref<8x1xf32, #tpu.memory_space<vmem>>, %arg4: memref<8x1xf32, #tpu.memory_space<vmem>>, %arg5: memref<8x256xf32, #tpu.memory_space<vmem>>) attributes {dimension_semantics = [#tpu.dimension_semantics<parallel>, #tpu.dimension_semantics<parallel>], iteration_bounds = array<i64: 1, 1>, scalar_prefetch = 0 : i64, scratch_operands = 0 : i64, tpu.core_type = #tpu.core_type<tc>, window_params = [{transform_indices = @transform_0, window_bounds = array<i64: 8, 256>}, {transform_indices = @transform_1, window_bounds = array<i64: 8, 1>}, {transform_indices = @transform_2, window_bounds = array<i64: 8, 1>}, {transform_indices = @transform_3, window_bounds = array<i64: 8, 256>}]} {
    %c0 = arith.constant 0 : index
    %c0_0 = arith.constant 0 : index
    %0 = vector.load %arg2[%c0, %c0_0] : memref<8x256xf32, #tpu.memory_space<vmem>>, vector<8x256xf32>
    %c0_1 = arith.constant 0 : index
    %c0_2 = arith.constant 0 : index
    %1 = vector.load %arg3[%c0_1, %c0_2] : memref<8x1xf32, #tpu.memory_space<vmem>>, vector<8x1xf32>
    %2 = vector.broadcast %1 : vector<8x1xf32> to vector<8x256xf32>
    %3 = arith.mulf %0, %2 : vector<8x256xf32>
    %c0_3 = arith.constant 0 : index
    %c0_4 = arith.constant 0 : index
    %4 = vector.load %arg4[%c0_3, %c0_4] : memref<8x1xf32, #tpu.memory_space<vmem>>, vector<8x1xf32>
    %5 = vector.broadcast %4 : vector<8x1xf32> to vector<8x256xf32>
    %6 = arith.addf %3, %5 : vector<8x256xf32>
    %c0_5 = arith.constant 0 : index
    %c0_6 = arith.constant 0 : index
    %7 = vector.load %arg5[%c0_5, %c0_6] : memref<8x256xf32, #tpu.memory_space<vmem>>, vector<8x256xf32>
    tpu.vector_store %arg5[%c0_5, %c0_6], %6 {strides = array<i32>} : memref<8x256xf32, #tpu.memory_space<vmem>>, vector<8x256xf32>,
    return
  }
  func.func @transform_0(%arg0: i32, %arg1: i32) -> (i32, i32) {
    %c0_i32 = arith.constant 0 : i32
    return %arg0, %arg1 : i32, i32
  }
  func.func @transform_1(%arg0: i32, %arg1: i32) -> (i32, i32) {
    %c0_i32 = arith.constant 0 : i32
    %c0_i32_0 = arith.constant 0 : i32
    return %arg0, %c0_i32 : i32, i32
  }
  func.func @transform_2(%arg0: i32, %arg1: i32) -> (i32, i32) {
    %c0_i32 = arith.constant 0 : i32
    %c0_i32_0 = arith.constant 0 : i32
    return %arg0, %c0_i32 : i32, i32
  }
  func.func @transform_3(%arg0: i32, %arg1: i32) -> (i32, i32) {
    %c0_i32 = arith.constant 0 : i32
    return %arg0, %arg1 : i32, i32
  }
}

</mosaic_0001>

<bundles_post_ra>
// kernel: tile.18
= control target key start
LH: loop header
LB: loop body
LE: loop exit
PB: predicated region body
PF: predicated region fallthrough
CT: control target
= control target key end

     0   :  { %s22_s0 = inlined_call_operand.vmem [shape: f32[4], index: 0, kind: input, shape index: {}]   ;;  %s23_s1 = inlined_call_operand.vmem [shape: f32[2,4], index: 1, kind: output, shape index: {}]  }
   0x1   :  { %v4_v0 = vld [vmem:[%s22_s0] ss:$0 sm:$0xff] }
   0x2   :  { %5 = vst [vmem:[%s23_s1] sm:$0x3] %v4_v0 }

// kernel: tile.0
= control target key start
LH: loop header
LB: loop body
LE: loop exit
PB: predicated region body
PF: predicated region fallthrough
CT: control target
= control target key end

     0   :  { %s34_s8 = smov 125   ;;  %vm7_vm0 = vcmask 7168   ;;  %s35_s11 = smov 126   ;;  %s61_s0 = inlined_call_operand.vmem [shape: f32[2,4], index: 0, kind: input, shape index: {}]   ;;  %s62_s1 = inlined_call_operand.vmem [shape: f32[8,1], index: 1, kind: output, shape index: {}]  }
   0x1   :  { %v4_v0 = vld [vmem:[%s61_s0] sm:$0x3]  ;;  %s33_s0 = smov 127  }
   0x2   :  { %5 = vst [vmem:[#allocation0] sm:$0x3] %v4_v0 }
   0x9   :  { %v9_v1 = vld [vmem:[#allocation0] sm:$0x3]  }
   0xa   :  { %v21_v2 = vld [vmem:[#allocation0] sm:$0x3]   ;;  %10 = vrot.lane.b32.xlu0 %v9_v1, %s33_s0 }
   0xb   :  { %22 = vrot.lane.b32.xlu1 %v21_v2, %s34_s8  ;;  %v6_v3 = vld [vmem:[#allocation0] sm:$0x3]  }
   0xc   :  { %v15_v4 = vld [vmem:[#allocation0] sm:$0x3]   ;;  %8 = vst.msk [vmem:[%s62_s1] ss:$4 sm:$0x3] %vm7_vm0, %v6_v3  }
   0xe   :  { %16 = vrot.lane.b32.xlu0 %v15_v4, %s35_s11 }
  0x7c   :  { %v11_v5 = vpop.permute.xlu0 %10  }
  0x7d   :  { %v23_v6 = vpop.permute.xlu1 %22   ;;  %27 = vst.msk [vmem:[%s62_s1 + $0x1] ss:$4 sm:$0x3] %vm7_vm0, %v11_v5  }
  0x7e   :  { %29 = vst.msk [vmem:[%s62_s1 + $0x3] ss:$4 sm:$0x3] %vm7_vm0, %v23_v6  }
  0x80   :  { %v17_v7 = vpop.permute.xlu0 %16  }
  0x81   :  { %28 = vst.msk [vmem:[%s62_s1 + $0x2] ss:$4 sm:$0x3] %vm7_vm0, %v17_v7  }

// kernel: _bn_inference_impl.1
= control target key start
LH: loop header
LB: loop body
LE: loop exit
PB: predicated region body
PF: predicated region fallthrough
CT: control target
= control target key end

     0   :  { %v40_v0 = vmov 0   ;;  %s79_s1 = inlined_call_operand.vmem [shape: f32[8,1], index: 1, kind: input, shape index: {}]   ;;  %s80_s2 = inlined_call_operand.vmem [shape: f32[8,1], index: 2, kind: input, shape index: {}]   ;;  %s81_s0 = inlined_call_operand.vmem [shape: f32[8,256], index: 0, kind: input, shape index: {}]   ;;  %s82_s3 = inlined_call_operand.vmem [shape: f32[8,256], index: 3, kind: output, shape index: {}]  }
   0x1   :  { %39 = vset.pattern.permute.xlu0 %v40_v0  ;;  %v16_v1 = vld [vmem:[%s79_s1] sm:$0xff]  ;;  %v15_v5 = vld [vmem:[%s81_s0 + $0x8] sm:$0xff] }
   0x2   :  { %19 = vperm.xlu0 %39, %v16_v1   ;;  %v24_v2 = vld [vmem:[%s80_s2] sm:$0xff] }
   0x3   :  { %v14_v4 = vld [vmem:[%s81_s0] sm:$0xff] }
   0x6   :  { %27 = vperm.xlu0 %39, %v24_v2  }
  0x81   :  { %v20_v3 = vpop.permute.xlu0 %19 }
  0x82   :  { %v22_v6 = vmul.f32 %v20_v3, %v14_v4  ;;  %v23_v7 = vmul.f32 %v20_v3, %v15_v5 }
  0x85   :  { %v28_v8 = vpop.permute.xlu0 %27 }
  0x86   :  { %v30_v9 = vadd.f32 %v28_v8, %v22_v6  ;;  %v31_v10 = vadd.f32 %v28_v8, %v23_v7 }
  0x88   :  { %32 = vst [vmem:[%s82_s3] sm:$0xff] %v30_v9  ;;  %33 = vst [vmem:[%s82_s3 + $0x8] sm:$0xff] %v31_v10 }

</bundles_post_ra>
